<compile_context>
chip_gen: v7x
topology: tpu7x:2x2x1
jax: 0.10.0
libtpu: 0.0.40
codegen_flags: <defaults>
</compile_context>

<pallas_src>
import jax
import jax.numpy as jnp
from jax.experimental import pallas as pl
from jax.experimental.pallas import tpu as pltpu

MNIST_FLAT_DIM = 28 * 28


def _round_up(n, m):
    return ((n + m - 1) // m) * m


def _cdiv(a, b):
    return (a + b - 1) // b


# --------------------------------------------------------------------------- kernel
def mnist_mlp_kernel(x_ref, w1_ref, b1_ref, w2_ref, b2_ref, o_ref):
    """Fused forward for one batch tile.

    x_ref:  (tile_b, F)      input dtype (f32 or bf16), cast in-kernel to w1 dtype
    w1_ref: (F, H_pad)       compute dtype (pre-cast in prepare_params)
    b1_ref: (1, H_pad)       f32
    w2_ref: (H_pad, O_pad)   compute dtype
    b2_ref: (1, O_pad)       f32; padded class lanes hold -1e30 so softmax gives them 0
    o_ref:  (tile_b, O_pad)  f32 lane-dense output slab
    """
    # Cast for the MXU inside the kernel (MXU is idle; HBM read of x stays single-pass).
    x = x_ref[...].astype(w1_ref.dtype)

    # Linear(F, H) + ReLU (f32 MXU accumulate, f32 elementwise).
    h = jnp.dot(x, w1_ref[...], preferred_element_type=jnp.float32) + b1_ref[...]
    h = jnp.maximum(h, 0.0)

    # TODO(synk): nn.Dropout(p=0.5) is identity in eval mode; training-mode stochastic
    # masking (pltpu.prng_seed / prng_random_bits + 1/(1-p) scaling) not implemented.

    # Linear(H, O): dot inputs in compute dtype, accumulate f32.
    h = h.astype(w2_ref.dtype)
    logits = jnp.dot(h, w2_ref[...], preferred_element_type=jnp.float32) + b2_ref[...]

    # Numerically stable softmax over the padded, lane-dense class axis.
    m = jnp.max(logits, axis=-1, keepdims=True)
    e = jnp.exp(logits - m)
    s = jnp.sum(e, axis=-1, keepdims=True)
    o_ref[...] = (e * pl.reciprocal(s, approx=False)).astype(o_ref.dtype)


# --------------------------------------------------------------------- params / prep
def init_params(key, input_dim=MNIST_FLAT_DIM, hidden_dim=98, output_dim=10):
    """PyTorch nn.Linear default init: U(-1/sqrt(fan_in), 1/sqrt(fan_in)).
    Weights stored (in, out) so the kernel computes x @ W (== x @ W_pt.T)."""
    params = {}
    for idx, (fan_in, fan_out) in enumerate(
            [(input_dim, hidden_dim), (hidden_dim, output_dim)], start=1):
        key, kw, kb = jax.random.split(key, 3)
        bound = 1.0 / (fan_in ** 0.5)
        params[f"w{idx}"] = jax.random.uniform(
            kw, (fan_in, fan_out), jnp.float32, -bound, bound)
        params[f"b{idx}"] = jax.random.uniform(
            kb, (1, fan_out), jnp.float32, -bound, bound)
    return params


def prepare_params(params, compute_dtype=jnp.float32):
    """One-time padding + casting of the weights to lane-dense (128-padded) slabs.
    Done once (not per forward call) so no pad/convert XLA ops re-execute per step."""
    w1, b1 = params["w1"], params["b1"]   # (F, H), (1, H)
    w2, b2 = params["w2"], params["b2"]   # (H, O), (1, O)
    F_in, H = w1.shape
    O = w2.shape[1]
    H_pad = _round_up(H, 128)
    O_pad = _round_up(O, 128)

    w1p = jnp.zeros((F_in, H_pad), jnp.float32).at[:, :H].set(w1).astype(compute_dtype)
    b1p = jnp.zeros((1, H_pad), jnp.float32).at[:, :H].set(b1)
    w2p = jnp.zeros((H_pad, O_pad), jnp.float32).at[:H, :O].set(w2).astype(compute_dtype)
    # Padded class lanes get a huge negative bias -> exp() flushes them to exactly 0.
    b2p = jnp.full((1, O_pad), -1e30, jnp.float32).at[:, :O].set(b2)

    return {"w1": w1p, "b1": b1p, "w2": w2p, "b2": b2p,
            "dims": (F_in, H, O, H_pad, O_pad)}


# ---------------------------------------------------------------------------- forward
def mnist_mlp_forward(x, prepared, *, tile_b=1024):
    """x: anything reshapeable to (-1, input_dim). Returns (B, output_dim) f32 softmax.

    tile_b=1024 fits v5e's 16 MiB scoped-VMEM default (~10 MB double-buffered); raise
    to 2048 on v6e/v7x for ~15% less per-step overhead (vmem_limit_bytes scales along).
    """
    w1p, b1p, w2p, b2p = prepared["w1"], prepared["b1"], prepared["w2"], prepared["b2"]
    F_in, H, O, H_pad, O_pad = prepared["dims"]

    x2 = jnp.reshape(x, (-1, F_in))          # no extra dtype-cast pass over x
    B = x2.shape[0]

    # Balanced, (8,128)-legal batch tiling: at most 7 wasted rows per tile.
    num_tiles = max(1, _cdiv(B, tile_b))
    if num_tiles == 1 and B >= 512:
        num_tiles = 2                        # give v7x's 2nd TensorCore work
    tile = _round_up(_cdiv(B, num_tiles), 8)
    B_pad = tile * num_tiles
    if B_pad != B:
        x2 = jnp.pad(x2, ((0, B_pad - B), (0, 0)))
    grid = (num_tiles,)

    x_itemsize = jnp.dtype(x2.dtype).itemsize
    w_itemsize = jnp.dtype(w1p.dtype).itemsize

    # Double-buffered VMEM footprint (lane dim of x pads to a multiple of 128 in VMEM).
    F_lane = _round_up(F_in, 128)
    w_bytes = (F_in * H_pad + H_pad * O_pad) * w_itemsize + (H_pad + O_pad) * 4
    footprint = (2 * tile * F_lane * x_itemsize      # x tile, double-buffered
                 + 2 * tile * O_pad * 4              # out tile, double-buffered
                 + 2 * w_bytes)                      # resident weights/biases
    vmem_limit = int(1.5 * footprint) + (4 << 20)

    cost = pl.CostEstimate(
        flops=2 * B_pad * (F_in * H_pad + H_pad * O_pad),
        transcendentals=B_pad * O_pad,
        bytes_accessed=(B_pad * F_in * x_itemsize + w_bytes + B_pad * O_pad * 4),
    )

    # Weights/biases: full (untiled) blocks with constant index_map -> VMEM-resident.
    def full(arr):
        return pl.BlockSpec(arr.shape, lambda i: (0, 0))

    out = pl.pallas_call(
        mnist_mlp_kernel,
        out_shape=jax.ShapeDtypeStruct((B_pad, O_pad), jnp.float32),
        grid_spec=pltpu.PrefetchScalarGridSpec(
            num_scalar_prefetch=0,
            grid=grid,
            in_specs=[
                pl.BlockSpec((tile, F_in), lambda i: (i, 0)),   # x batch tile
                full(w1p), full(b1p), full(w2p), full(b2p),
            ],
            out_specs=pl.BlockSpec((tile, O_pad), lambda i: (i, 0)),
        ),
        compiler_params=pltpu.CompilerParams(
            dimension_semantics=("parallel",),
            vmem_limit_bytes=vmem_limit,
        ),
        cost_estimate=cost,
    )(x2, w1p, b1p, w2p, b2p)

    # Strip batch padding and the padded (zero-probability) classes.
    return out[:B, :O]


# -------------------------------------------------------------------------- reference
def mnist_mlp_reference(x, params):
    xf = jnp.reshape(x, (-1, params["w1"].shape[0])).astype(jnp.float32)
    h = jnp.maximum(jnp.dot(xf, params["w1"], precision="highest") + params["b1"], 0.0)
    logits = jnp.dot(h, params["w2"], precision="highest") + params["b2"]
    return jax.nn.softmax(logits, axis=-1)


if __name__ == "__main__":
    key = jax.random.PRNGKey(0)
    kx, kp = jax.random.split(key)

    # Small MNIST-like batch: (16, 1, 28, 28) images, flattened to (16, 784) in-wrapper.
    batch = 16
    x = jax.random.normal(kx, (batch, 1, 28, 28), jnp.float32)
    params = init_params(kp)

    # f32 path.
    prep_f32 = prepare_params(params, compute_dtype=jnp.float32)
    out = jax.block_until_ready(mnist_mlp_forward(x, prep_f32))
    ref = mnist_mlp_reference(x, params)

    assert out.shape == (batch, 10)
    assert jnp.allclose(jnp.sum(out, axis=-1), 1.0, atol=1e-5), "softmax rows must sum to 1"
    assert jnp.allclose(out, ref, atol=1e-4), "f32 kernel mismatch vs reference"

    # bf16 dot-input path (f32 accumulate): weights pre-cast once, x cast in-kernel.
    prep_bf16 = prepare_params(params, compute_dtype=jnp.bfloat16)
    out_bf16 = jax.block_until_ready(mnist_mlp_forward(x, prep_bf16))
    assert jnp.allclose(out_bf16, ref, atol=5e-2), "bf16 kernel mismatch vs reference"

    print("KERNEL_OK")
</pallas_src>

<mosaic_0001>
module attributes {stable_mosaic.version = 11 : i64} {
  func.func @mnist_mlp_kernel(%arg0: i32, %arg1: memref<16x784xf32, #tpu.memory_space<vmem>>, %arg2: memref<784x128xf32, #tpu.memory_space<vmem>>, %arg3: memref<1x128xf32, #tpu.memory_space<vmem>>, %arg4: memref<128x128xf32, #tpu.memory_space<vmem>>, %arg5: memref<1x128xf32, #tpu.memory_space<vmem>>, %arg6: memref<16x128xf32, #tpu.memory_space<vmem>>) attributes {dimension_semantics = [#tpu.dimension_semantics<parallel>], iteration_bounds = array<i64: 1>, scalar_prefetch = 0 : i64, scratch_operands = 0 : i64, tpu.core_type = #tpu.core_type<tc>, window_params = [{transform_indices = @transform_0, window_bounds = array<i64: 16, 784>}, {pipeline_mode = #tpu.pipeline_mode<synchronous>, transform_indices = @transform_1, window_bounds = array<i64: 784, 128>}, {pipeline_mode = #tpu.pipeline_mode<synchronous>, transform_indices = @transform_2, window_bounds = array<i64: 1, 128>}, {pipeline_mode = #tpu.pipeline_mode<synchronous>, transform_indices = @transform_3, window_bounds = array<i64: 128, 128>}, {pipeline_mode = #tpu.pipeline_mode<synchronous>, transform_indices = @transform_4, window_bounds = array<i64: 1, 128>}, {transform_indices = @transform_5, window_bounds = array<i64: 16, 128>}]} {
    %c0 = arith.constant 0 : index
    %c0_0 = arith.constant 0 : index
    %0 = vector.load %arg1[%c0, %c0_0] : memref<16x784xf32, #tpu.memory_space<vmem>>, vector<16x784xf32>
    %c0_1 = arith.constant 0 : index
    %c0_2 = arith.constant 0 : index
    %1 = vector.load %arg2[%c0_1, %c0_2] : memref<784x128xf32, #tpu.memory_space<vmem>>, vector<784x128xf32>
    %cst = arith.constant dense<0.000000e+00> : vector<16x128xf32>
    %2 = tpu.matmul %0, %1, %cst {dimension_numbers = #tpu.dot_dimension_numbers<[1], [0], [0], [1], [0, 0, 1, 1], [], []>} : vector<16x784xf32>, vector<784x128xf32>, vector<16x128xf32> -> vector<16x128xf32>
    %c0_3 = arith.constant 0 : index
    %c0_4 = arith.constant 0 : index
    %3 = vector.load %arg3[%c0_3, %c0_4] : memref<1x128xf32, #tpu.memory_space<vmem>>, vector<1x128xf32>
    %4 = vector.broadcast %3 : vector<1x128xf32> to vector<16x128xf32>
    %5 = arith.addf %2, %4 : vector<16x128xf32>
    %cst_5 = arith.constant 0.000000e+00 : f32
    %6 = vector.broadcast %cst_5 : f32 to vector<16x128xf32>
    %7 = arith.maximumf %5, %6 : vector<16x128xf32>
    %c0_6 = arith.constant 0 : index
    %c0_7 = arith.constant 0 : index
    %8 = vector.load %arg4[%c0_6, %c0_7] : memref<128x128xf32, #tpu.memory_space<vmem>>, vector<128x128xf32>
    %cst_8 = arith.constant dense<0.000000e+00> : vector<16x128xf32>
    %9 = tpu.matmul %7, %8, %cst_8 {dimension_numbers = #tpu.dot_dimension_numbers<[1], [0], [0], [1], [0, 0, 1, 1], [], []>} : vector<16x128xf32>, vector<128x128xf32>, vector<16x128xf32> -> vector<16x128xf32>
    %c0_9 = arith.constant 0 : index
    %c0_10 = arith.constant 0 : index
    %10 = vector.load %arg5[%c0_9, %c0_10] : memref<1x128xf32, #tpu.memory_space<vmem>>, vector<1x128xf32>
    %11 = vector.broadcast %10 : vector<1x128xf32> to vector<16x128xf32>
    %12 = arith.addf %9, %11 : vector<16x128xf32>
    %cst_11 = arith.constant dense<0xFF800000> : vector<16xf32>
    %13 = vector.multi_reduction <maximumf>, %12, %cst_11 [1] : vector<16x128xf32> to vector<16xf32>
    %14 = vector.shape_cast %13 : vector<16xf32> to vector<16x1xf32>
    %15 = vector.broadcast %14 : vector<16x1xf32> to vector<16x128xf32>
    %16 = arith.subf %12, %15 : vector<16x128xf32>
    %17 = math.exp %16 : vector<16x128xf32>
    %cst_12 = arith.constant dense<0.000000e+00> : vector<16xf32>
    %18 = vector.multi_reduction <add>, %17, %cst_12 [1] : vector<16x128xf32> to vector<16xf32>
    %19 = vector.shape_cast %18 : vector<16xf32> to vector<16x1xf32>
    %20 = tpu.reciprocal %19 : vector<16x1xf32> -> vector<16x1xf32>
    %21 = vector.broadcast %20 : vector<16x1xf32> to vector<16x128xf32>
    %22 = arith.mulf %17, %21 : vector<16x128xf32>
    %c0_13 = arith.constant 0 : index
    %c0_14 = arith.constant 0 : index
    %23 = vector.load %arg6[%c0_13, %c0_14] : memref<16x128xf32, #tpu.memory_space<vmem>>, vector<16x128xf32>
    tpu.vector_store %arg6[%c0_13, %c0_14], %22 {strides = array<i32>} : memref<16x128xf32, #tpu.memory_space<vmem>>, vector<16x128xf32>,
    return
  }
  func.func @transform_0(%arg0: i32) -> (i32, i32) {
    %c0_i32 = arith.constant 0 : i32
    %c0_i32_0 = arith.constant 0 : i32
    return %arg0, %c0_i32 : i32, i32
  }
  func.func @transform_1(%arg0: i32) -> (i32, i32) {
    %c0_i32 = arith.constant 0 : i32
    %c0_i32_0 = arith.constant 0 : i32
    %c0_i32_1 = arith.constant 0 : i32
    return %c0_i32, %c0_i32_0 : i32, i32
  }
  func.func @transform_2(%arg0: i32) -> (i32, i32) {
    %c0_i32 = arith.constant 0 : i32
    %c0_i32_0 = arith.constant 0 : i32
    %c0_i32_1 = arith.constant 0 : i32
    return %c0_i32, %c0_i32_0 : i32, i32
  }
  func.func @transform_3(%arg0: i32) -> (i32, i32) {
    %c0_i32 = arith.constant 0 : i32
    %c0_i32_0 = arith.constant 0 : i32
    %c0_i32_1 = arith.constant 0 : i32
    return %c0_i32, %c0_i32_0 : i32, i32
  }
  func.func @transform_4(%arg0: i32) -> (i32, i32) {
    %c0_i32 = arith.constant 0 : i32
    %c0_i32_0 = arith.constant 0 : i32
    %c0_i32_1 = arith.constant 0 : i32
    return %c0_i32, %c0_i32_0 : i32, i32
  }
  func.func @transform_5(%arg0: i32) -> (i32, i32) {
    %c0_i32 = arith.constant 0 : i32
    %c0_i32_0 = arith.constant 0 : i32
    return %arg0, %c0_i32 : i32, i32
  }
}

</mosaic_0001>

<bundles_post_ra>
// kernel: tpu_custom_call.1
= control target key start
LH: loop header
LB: loop body
LE: loop exit
PB: predicated region body
PF: predicated region fallthrough
CT: control target
= control target key end

     0   :  { %10 = vsyncpa [#allocation3], 0  ;;  %s1151_s0 = inlined_call_operand.hbm [shape: f32[16,784], index: 0, kind: input, shape index: {}]   ;;  %s1152_s1 = inlined_call_operand.hbm [shape: f32[784,128], index: 1, kind: input, shape index: {}]   ;;  %s1153_s2 = inlined_call_operand.vmem [shape: f32[1,128], index: 2, kind: input, shape index: {}]   ;;  %s1154_s3 = inlined_call_operand.hbm [shape: f32[128,128], index: 3, kind: input, shape index: {}]   ;;  %s1155_s4 = inlined_call_operand.vmem [shape: f32[1,128], index: 4, kind: input, shape index: {}]   ;;  %s1156_s5 = inlined_call_operand.hbm [shape: f32[16,128], index: 5, kind: output, shape index: {}]  }
   0x1   :  { %11 = vsyncpa [#allocation6], 0 }
   0x2   :  { %12 = vsyncpa [#allocation4], 0  ;;  %s1050_s18 = smov [#allocation5]   ;;  %s956_s22 = scalar_lea.hbm %s1152_s1, 12544 }
   0x3   :  { %s30_s19 = sshll.u32 %s1050_s18, 4  ;;  %p957_p0 = scmp.ne.s32.totalorder %s1152_s1, %s956_s22  ;;  %s31_s19 = int_to_ptr.vmem [resolvable:$true] %s30_s19 }
   0x4   :  { %p960_p1 = scmp.lt.u32.totalorder %s956_s22, %s1152_s1 }
   0x6   :  { %p962_p2 = pnand %p960_p1, %p957_p0 }
   0x8   :  { %965 = shalt.err (!%p962_p2)
}
   0x9   :  { %s966_s27 = scalar_lea.vmem %s31_s19, 12544  ;;  %p971_p4 = scmp.lt.s32.totalorder %s31_s19, %s31_s19 }
   0xa   :  { %p967_p3 = scmp.ne.s32.totalorder %s31_s19, %s966_s27  ;;  %p972_p5 = scmp.lt.s32.totalorder %s966_s27, %s966_s27 }
   0xc   :  { %p973_p6 = por %p972_p5, %p971_p4 }
   0xe   :  { %p974_p7 = pnand %p973_p6, %p967_p3 }
  0x10   :  { %977 = shalt.err (!%p974_p7)
}
  0x11   :  { %s1051_s28 = smov 128   ;;  %s1052_s29 = smov 8  }
  0x12   :  { %36 = dma.hbm_to_vmem [thread:$0]  %s1152_s1, 12544, %s31_s19, [#allocation6], %s1051_s28, %s1051_s28, %s1052_s29  }
  0x13   :  { %s1053_s7 = smov [#allocation2]   ;;  %s978_s11 = scalar_lea.hbm %s1151_s0, 1792 }
  0x14   :  { %s18_s8 = sshll.u32 %s1053_s7, 4  ;;  %p979_p8 = scmp.ne.s32.totalorder %s1151_s0, %s978_s11  ;;  %s19_s8 = int_to_ptr.vmem [resolvable:$true] %s18_s8 }
  0x15   :  { %p982_p9 = scmp.lt.u32.totalorder %s978_s11, %s1151_s0 }
  0x17   :  { %p984_p10 = pnand %p982_p9, %p979_p8 }
  0x19   :  { %987 = shalt.err (!%p984_p10)
}
  0x1a   :  { %s988_s16 = scalar_lea.vmem %s19_s8, 1792  ;;  %p993_p12 = scmp.lt.s32.totalorder %s19_s8, %s19_s8 }
  0x1b   :  { %p989_p11 = scmp.ne.s32.totalorder %s19_s8, %s988_s16  ;;  %p994_p13 = scmp.lt.s32.totalorder %s988_s16, %s988_s16 }
  0x1d   :  { %p995_p0 = por %p994_p13, %p993_p12 }
  0x1f   :  { %p996_p1 = pnand %p995_p0, %p989_p11 }
  0x21   :  { %999 = shalt.err (!%p996_p1)
}
  0x22   :  { %s1054_s1 = smov 896   ;;  %s1055_s17 = smov 56  }
  0x23   :  { %24 = dma.hbm_to_vmem [thread:$0]  %s1151_s0, 1792, %s19_s8, [#allocation3], %s1054_s1, %s1054_s1, %s1055_s17  }
  0x24   :  { %s1056_s20 = smov [#allocation7]   ;;  %s1000_s24 = scalar_lea.hbm %s1154_s3, 2048 }
  0x25   :  { %s44_s21 = sshll.u32 %s1056_s20, 4  ;;  %p1001_p2 = scmp.ne.s32.totalorder %s1154_s3, %s1000_s24  ;;  %s45_s21 = int_to_ptr.vmem [resolvable:$true] %s44_s21 }
  0x26   :  { %p1004_p3 = scmp.lt.u32.totalorder %s1000_s24, %s1154_s3 }
  0x28   :  { %p1006_p4 = pnand %p1004_p3, %p1001_p2 }
  0x2a   :  { %1009 = shalt.err (!%p1006_p4)
}
  0x2b   :  { %s1010_s6 = scalar_lea.vmem %s45_s21, 2048  ;;  %p1015_p6 = scmp.lt.s32.totalorder %s45_s21, %s45_s21 }
  0x2c   :  { %p1011_p5 = scmp.ne.s32.totalorder %s45_s21, %s1010_s6  ;;  %p1016_p7 = scmp.lt.s32.totalorder %s1010_s6, %s1010_s6 }
  0x2e   :  { %p1017_p8 = por %p1016_p7, %p1015_p6 }
  0x30   :  { %p1018_p9 = pnand %p1017_p8, %p1011_p5 }
  0x32   :  { %1021 = shalt.err (!%p1018_p9)
}
  0x33   :  { %50 = dma.hbm_to_vmem [thread:$0]  %s1154_s3, 2048, %s45_s21, [#allocation6], %s1051_s28, %s1051_s28, %s1052_s29  }
  0x34   :  { %1044 = dma.done.wait [#allocation3], 1792  }
  0x35   :  { %1045 = vsyncadd [#allocation3], 4294965504 }
  0x36   :  { %1046 = dma.done.wait [#allocation6], 14592  }
  0x37   :  { %1047 = vsyncadd [#allocation6], 4294952704  ;;  %v92_v0 = vld [vmem:[#allocation5 + $0x80] sm:$0xff]  ;;  %v93_v1 = vld [vmem:[#allocation5 + $0x88] sm:$0xff]  ;;  %vm181_vm0 = vcmask 130048  }
  0x38   :  { %v76_v2 = vld [vmem:[#allocation5] sm:$0xff]  ;;  %v808_v3 = vpack.c.bf16 %v93_v1, %v92_v0  ;;  %v77_v4 = vld [vmem:[#allocation5 + $0x8] sm:$0xff]  ;;  %v94_v11 = vld [vmem:[#allocation5 + $0x90] sm:$0xff] }
  0x39   :  { %v124_v5 = vld [vmem:[#allocation5 + $0x180] sm:$0xff]  ;;  %v125_v6 = vld [vmem:[#allocation5 + $0x188] sm:$0xff]  ;;  %v810_v7 = vpack.c.bf16 %v77_v4, %v76_v2  ;;  %v95_v13 = vld [vmem:[#allocation5 + $0x98] sm:$0xff] }
  0x3a   :  { %v840_v8 = vpack.c.bf16 %v125_v6, %v124_v5  ;;  %v108_v9 = vld [vmem:[#allocation5 + $0x100] sm:$0xff]  ;;  %v109_v10 = vld [vmem:[#allocation5 + $0x108] sm:$0xff]  ;;  %809 = vmatprep.subr.bf16.mxu0 %v808_v3  ;;  %v78_v14 = vld [vmem:[#allocation5 + $0x10] sm:$0xff]  ;;  %v812_v16 = vpack.c.bf16 %v95_v13, %v94_v11 }
  0x3b   :  { %v842_v12 = vpack.c.bf16 %v109_v10, %v108_v9  ;;  %v79_v15 = vld [vmem:[#allocation5 + $0x18] sm:$0xff]  ;;  %811 = vmatpush3.bf16.msra.mxu0 %v810_v7  ;;  %v126_v18 = vld [vmem:[#allocation5 + $0x190] sm:$0xff]  ;;  %v96_v23 = vld [vmem:[#allocation5 + $0xa0] sm:$0xff] }
  0x3c   :  { %841 = vmatprep.subr.bf16.mxu1 %v840_v8  ;;  %v814_v17 = vpack.c.bf16 %v79_v15, %v78_v14  ;;  %v127_v19 = vld [vmem:[#allocation5 + $0x198] sm:$0xff]  ;;  %v110_v20 = vld [vmem:[#allocation5 + $0x110] sm:$0xff]  ;;  %v97_v24 = vld [vmem:[#allocation5 + $0xa8] sm:$0xff]  ;;  %813 = vmatprep.subr.bf16.mxu0 %v812_v16 }
  0x3d   :  { %843 = vmatpush3.bf16.msra.mxu1 %v842_v12  ;;  %v844_v21 = vpack.c.bf16 %v127_v19, %v126_v18  ;;  %v111_v22 = vld [vmem:[#allocation5 + $0x118] sm:$0xff]  ;;  %v816_v26 = vpack.c.bf16 %v97_v24, %v96_v23  ;;  %v80_v27 = vld [vmem:[#allocation5 + $0x20] sm:$0xff]  ;;  %v81_v28 = vld [vmem:[#allocation5 + $0x28] sm:$0xff] }
  0x3e   :  { %v846_v25 = vpack.c.bf16 %v111_v22, %v110_v20  ;;  %v128_v29 = vld [vmem:[#allocation5 + $0x1a0] sm:$0xff]  ;;  %v129_v30 = vld [vmem:[#allocation5 + $0x1a8] sm:$0xff]  ;;  %v818_v33 = vpack.c.bf16 %v81_v28, %v80_v27  ;;  %v98_v35 = vld [vmem:[#allocation5 + $0xb0] sm:$0xff] }
  0x3f   :  { %845 = vmatprep.subr.bf16.mxu1 %v844_v21  ;;  %v112_v31 = vld [vmem:[#allocation5 + $0x120] sm:$0xff]  ;;  %v113_v32 = vld [vmem:[#allocation5 + $0x128] sm:$0xff]  ;;  %815 = vmatpush3.bf16.msra.mxu0 %v814_v17  ;;  %v848_v34 = vpack.c.bf16 %v129_v30, %v128_v29  ;;  %v99_v36 = vld [vmem:[#allocation5 + $0xb8] sm:$0xff] }
  0x40   :  { %v82_v37 = vld [vmem:[#allocation5 + $0x30] sm:$0xff]  ;;  %817 = vmatprep.subr.bf16.mxu0 %v816_v26  ;;  %v850_v38 = vpack.c.bf16 %v113_v32, %v112_v31  ;;  %v820_v39 = vpack.c.bf16 %v99_v36, %v98_v35  ;;  %v83_v40 = vld [vmem:[#allocation5 + $0x38] sm:$0xff]  ;;  %v100_v46 = vld [vmem:[#allocation5 + $0xc0] sm:$0xff] }
  0x41   :  { %847 = vmatpush3.bf16.msra.mxu1 %v846_v25  ;;  %v130_v41 = vld [vmem:[#allocation5 + $0x1b0] sm:$0xff]  ;;  %v131_v42 = vld [vmem:[#allocation5 + $0x1b8] sm:$0xff]  ;;  %v101_v47 = vld [vmem:[#allocation5 + $0xc8] sm:$0xff]  ;;  %v822_v48 = vpack.c.bf16 %v83_v40, %v82_v37 }
  0x42   :  { %849 = vmatprep.subr.bf16.mxu1 %v848_v34  ;;  %v852_v43 = vpack.c.bf16 %v131_v42, %v130_v41  ;;  %v114_v44 = vld [vmem:[#allocation5 + $0x130] sm:$0xff]  ;;  %v115_v45 = vld [vmem:[#allocation5 + $0x138] sm:$0xff]  ;;  %v132_v49 = vld [vmem:[#allocation5 + $0x1c0] sm:$0xff]  ;;  %v824_v52 = vpack.c.bf16 %v101_v47, %v100_v46 }
  0x43   :  { %819 = vmatpush3.bf16.msra.mxu0 %v818_v33  ;;  %v133_v50 = vld [vmem:[#allocation5 + $0x1c8] sm:$0xff]  ;;  %v854_v51 = vpack.c.bf16 %v115_v45, %v114_v44  ;;  %v84_v53 = vld [vmem:[#allocation5 + $0x40] sm:$0xff]  ;;  %v102_v58 = vld [vmem:[#allocation5 + $0xd0] sm:$0xff] }
  0x44   :  { %821 = vmatprep.subr.bf16.mxu0 %v820_v39  ;;  %v85_v54 = vld [vmem:[#allocation5 + $0x48] sm:$0xff]  ;;  %v116_v55 = vld [vmem:[#allocation5 + $0x140] sm:$0xff]  ;;  %v856_v56 = vpack.c.bf16 %v133_v50, %v132_v49  ;;  %v103_v59 = vld [vmem:[#allocation5 + $0xd8] sm:$0xff] }
  0x45   :  { %851 = vmatpush3.bf16.msra.mxu1 %v850_v38  ;;  %v117_v57 = vld [vmem:[#allocation5 + $0x148] sm:$0xff]  ;;  %v134_v60 = vld [vmem:[#allocation5 + $0x1d0] sm:$0xff]  ;;  %v135_v61 = vld [vmem:[#allocation5 + $0x1d8] sm:$0xff]  ;;  %v826_v62 = vpack.c.bf16 %v85_v54, %v84_v53  ;;  %v828_v0 = vpack.c.bf16 %v103_v59, %v102_v58 }
  0x46   :  { %853 = vmatprep.subr.bf16.mxu1 %v852_v43  ;;  %v858_v63 = vpack.c.bf16 %v117_v57, %v116_v55  ;;  %v86_v1 = vld [vmem:[#allocation5 + $0x50] sm:$0xff]  ;;  %v87_v2 = vld [vmem:[#allocation5 + $0x58] sm:$0xff]  ;;  %v860_v4 = vpack.c.bf16 %v135_v61, %v134_v60  ;;  %v104_v6 = vld [vmem:[#allocation5 + $0xe0] sm:$0xff] }
  0x47   :  { %823 = vmatpush3.bf16.msra.mxu0 %v822_v48  ;;  %v118_v3 = vld [vmem:[#allocation5 + $0x150] sm:$0xff]  ;;  %v119_v5 = vld [vmem:[#allocation5 + $0x158] sm:$0xff]  ;;  %v105_v7 = vld [vmem:[#allocation5 + $0xe8] sm:$0xff]  ;;  %v830_v10 = vpack.c.bf16 %v87_v2, %v86_v1 }
  0x48   :  { %825 = vmatprep.subr.bf16.mxu0 %v824_v52  ;;  %v136_v8 = vld [vmem:[#allocation5 + $0x1e0] sm:$0xff]  ;;  %v137_v9 = vld [vmem:[#allocation5 + $0x1e8] sm:$0xff]  ;;  %v63_v12 = vld [vmem:[#allocation2 + $0x8] sm:$0xff]  ;;  %v862_v13 = vpack.c.bf16 %v119_v5, %v118_v3  ;;  %v832_v14 = vpack.c.bf16 %v105_v7, %v104_v6 }
  0x49   :  { %855 = vmatpush3.bf16.msra.mxu1 %v854_v51  ;;  %v88_v11 = vld [vmem:[#allocation5 + $0x60] sm:$0xff]  ;;  %v89_v15 = vld [vmem:[#allocation5 + $0x68] sm:$0xff]  ;;  %v864_v18 = vpack.c.bf16 %v137_v9, %v136_v8  ;;  %v106_v19 = vld [vmem:[#allocation5 + $0xf0] sm:$0xff]  ;;  %252 = vmatprep.mubr.f32.mxu0 %v63_v12 }
  0x4a   :  { %857 = vmatprep.subr.bf16.mxu1 %v856_v56  ;;  %v120_v16 = vld [vmem:[#allocation5 + $0x160] sm:$0xff]  ;;  %v121_v17 = vld [vmem:[#allocation5 + $0x168] sm:$0xff]  ;;  %v107_v20 = vld [vmem:[#allocation5 + $0xf8] sm:$0xff]  ;;  %v834_v24 = vpack.c.bf16 %v89_v15, %v88_v11 }
  0x4b   :  { %827 = vmatpush3.bf16.msra.mxu0 %v826_v62  ;;  %v65_v21 = vld [vmem:[#allocation2 + $0x18] sm:$0xff]  ;;  %v138_v22 = vld [vmem:[#allocation5 + $0x1f0] sm:$0xff]  ;;  %v139_v23 = vld [vmem:[#allocation5 + $0x1f8] sm:$0xff]  ;;  %v866_v25 = vpack.c.bf16 %v121_v17, %v120_v16  ;;  %v836_v26 = vpack.c.bf16 %v107_v20, %v106_v19 }
  0x4c   :  { %829 = vmatprep.subr.bf16.mxu0 %v828_v0  ;;  %327 = vmatprep.mubr.f32.mxu1 %v65_v21  ;;  %v90_v27 = vld [vmem:[#allocation5 + $0x70] sm:$0xff]  ;;  %v91_v28 = vld [vmem:[#allocation5 + $0x78] sm:$0xff]  ;;  %v868_v30 = vpack.c.bf16 %v139_v23, %v138_v22  ;;  %v156_v32 = vld [vmem:[#allocation5 + $0x280] sm:$0xff] }
  0x4d   :  { %859 = vmatpush3.bf16.msra.mxu1 %v858_v63  ;;  %v122_v29 = vld [vmem:[#allocation5 + $0x170] sm:$0xff]  ;;  %v123_v31 = vld [vmem:[#allocation5 + $0x178] sm:$0xff]  ;;  %v157_v33 = vld [vmem:[#allocation5 + $0x288] sm:$0xff]  ;;  %v838_v34 = vpack.c.bf16 %v91_v28, %v90_v27 }
  0x4e   :  { %861 = vmatprep.subr.bf16.mxu1 %v860_v4  ;;  %v870_v35 = vpack.c.bf16 %v123_v31, %v122_v29  ;;  %v872_v36 = vpack.c.bf16 %v157_v33, %v156_v32  ;;  %v140_v37 = vld [vmem:[#allocation5 + $0x200] sm:$0xff]  ;;  %v141_v38 = vld [vmem:[#allocation5 + $0x208] sm:$0xff]  ;;  %v158_v39 = vld [vmem:[#allocation5 + $0x290] sm:$0xff] }
  0x4f   :  { %831 = vmatpush3.bf16.msra.mxu0 %v830_v10  ;;  %v159_v40 = vld [vmem:[#allocation5 + $0x298] sm:$0xff]  ;;  %v62_v41 = vld [vmem:[#allocation2] sm:$0xff]  ;;  %v874_v42 = vpack.c.bf16 %v141_v38, %v140_v37  ;;  %v64_v43 = vld [vmem:[#allocation2 + $0x10] sm:$0xff] }
  0x50   :  { %833 = vmatprep.subr.bf16.mxu0 %v832_v14  ;;  %v876_v44 = vpack.c.bf16 %v159_v40, %v158_v39  ;;  %v142_v45 = vld [vmem:[#allocation5 + $0x210] sm:$0xff]  ;;  %v143_v46 = vld [vmem:[#allocation5 + $0x218] sm:$0xff]  ;;  %v160_v47 = vld [vmem:[#allocation5 + $0x2a0] sm:$0xff] }
  0x51   :  { %863 = vmatpush3.bf16.msra.mxu1 %v862_v13  ;;  %v161_v48 = vld [vmem:[#allocation5 + $0x2a8] sm:$0xff]  ;;  %v70_v49 = vld [vmem:[#allocation2 + $0x40] sm:$0xff]  ;;  %v172_v50 = vld [vmem:[#allocation5 + $0x300] sm:$0xff]  ;;  %v878_v53 = vpack.c.bf16 %v143_v46, %v142_v45 }
  0x52   :  { %865 = vmatprep.subr.bf16.mxu1 %v864_v18  ;;  %v72_v51 = vld [vmem:[#allocation2 + $0x50] sm:$0xff]  ;;  %v173_v52 = vld [vmem:[#allocation5 + $0x308] sm:$0xff]  ;;  %v880_v56 = vpack.c.bf16 %v161_v48, %v160_v47  ;;  %v71_v59 = vld [vmem:[#allocation2 + $0x48] sm:$0xff] }
  0x53   :  { %835 = vmatpush3.bf16.msra.mxu0 %v834_v24  ;;  %v69_v54 = vld [vmem:[#allocation2 + $0x38] sm:$0xff]  ;;  %v904_v55 = vpack.c.bf16 %v173_v52, %v172_v50  ;;  %v144_v57 = vld [vmem:[#allocation5 + $0x220] sm:$0xff]  ;;  %v162_v60 = vld [vmem:[#allocation5 + $0x2b0] sm:$0xff] }
  0x54   :  { %837 = vmatprep.subr.bf16.mxu0 %v836_v26  ;;  %v145_v58 = vld [vmem:[#allocation5 + $0x228] sm:$0xff]  ;;  %v163_v61 = vld [vmem:[#allocation5 + $0x2b8] sm:$0xff]  ;;  %v68_v63 = vld [vmem:[#allocation2 + $0x30] sm:$0xff] }
  0x55   :  { %867 = vmatpush3.bf16.msra.mxu1 %v866_v25  ;;  %v67_v62 = vld [vmem:[#allocation2 + $0x28] sm:$0xff]  ;;  %v882_v0 = vpack.c.bf16 %v145_v58, %v144_v57  ;;  %v884_v1 = vpack.c.bf16 %v163_v61, %v162_v60  ;;  %v146_v2 = vld [vmem:[#allocation5 + $0x230] sm:$0xff]  ;;  %v164_v5 = vld [vmem:[#allocation5 + $0x2c0] sm:$0xff] }
  0x56   :  { %869 = vmatprep.subr.bf16.mxu1 %v868_v30  ;;  %v147_v3 = vld [vmem:[#allocation5 + $0x238] sm:$0xff]  ;;  %v165_v6 = vld [vmem:[#allocation5 + $0x2c8] sm:$0xff]  ;;  %v148_v9 = vld [vmem:[#allocation5 + $0x240] sm:$0xff] }
  0x57   :  { %839 = vmatpush3.bf16.msra.mxu0 %v838_v34  ;;  %v75_v4 = vld [vmem:[#allocation2 + $0x68] sm:$0xff]  ;;  %v886_v7 = vpack.c.bf16 %v147_v3, %v146_v2  ;;  %v888_v8 = vpack.c.bf16 %v165_v6, %v164_v5  ;;  %v149_v10 = vld [vmem:[#allocation5 + $0x248] sm:$0xff]  ;;  %v166_v11 = vld [vmem:[#allocation5 + $0x2d0] sm:$0xff] }
  0x58   :  { %873 = vmatprep.subr.bf16.mxu0 %v872_v36  ;;  %v167_v12 = vld [vmem:[#allocation5 + $0x2d8] sm:$0xff]  ;;  %v890_v13 = vpack.c.bf16 %v149_v10, %v148_v9  ;;  %v150_v15 = vld [vmem:[#allocation5 + $0x250] sm:$0xff]  ;;  %v168_v17 = vld [vmem:[#allocation5 + $0x2e0] sm:$0xff] }
  0x59   :  { %871 = vmatpush3.bf16.msra.mxu1 %v870_v35  ;;  %v892_v14 = vpack.c.bf16 %v167_v12, %v166_v11  ;;  %v151_v16 = vld [vmem:[#allocation5 + $0x258] sm:$0xff]  ;;  %v169_v18 = vld [vmem:[#allocation5 + $0x2e8] sm:$0xff]  ;;  %v152_v21 = vld [vmem:[#allocation5 + $0x260] sm:$0xff] }
  0x5a   :  { %253 = vmatmul.mubr.f32.vlgmr.msra.gmra.mrb[0].mxu0 %v62_v41  ;;  %905 = vmatprep.subr.bf16.mxu1 %v904_v55  ;;  %v894_v19 = vpack.c.bf16 %v151_v16, %v150_v15  ;;  %v896_v20 = vpack.c.bf16 %v169_v18, %v168_v17  ;;  %v153_v22 = vld [vmem:[#allocation5 + $0x268] sm:$0xff]  ;;  %v170_v23 = vld [vmem:[#allocation5 + $0x2f0] sm:$0xff]  ;;  %v171_v24 = vld [vmem:[#allocation5 + $0x2f8] sm:$0xff] }
  0x5b   :  { %875 = vmatpush3.bf16.msra.mxu0 %v874_v42  ;;  %257 = vmatprep.mubr.f32.mxu0 %v70_v49  ;;  %v898_v25 = vpack.c.bf16 %v153_v22, %v152_v21  ;;  %v900_v26 = vpack.c.bf16 %v171_v24, %v170_v23  ;;  %v154_v27 = vld [vmem:[#allocation5 + $0x270] sm:$0xff]  ;;  %v155_v28 = vld [vmem:[#allocation5 + $0x278] sm:$0xff]  ;;  %v73_v32 = vld [vmem:[#allocation2 + $0x58] sm:$0xff] }
  0x5c   :  { %328 = vmatmul.mubr.f32.vlgmr.msra.gmra.mrb[0].mxu1 %v64_v43  ;;  %877 = vmatprep.subr.bf16.mxu0 %v876_v44  ;;  %v902_v29 = vpack.c.bf16 %v155_v28, %v154_v27  ;;  %v66_v30 = vld [vmem:[#allocation2 + $0x20] sm:$0xff]  ;;  %v491_v34 = vld [vmem:[#allocation7 + $0x8] sm:$0xff]  ;;  %v492_v35 = vld [vmem:[#allocation7 + $0x10] sm:$0xff] }
  0x5d   :  { %332 = vmatprep.mubr.f32.mxu1 %v72_v51  ;;  %907 = vmatpush3.bf16.msra.mxu1 %v904_v55  ;;  %v74_v31 = vld [vmem:[#allocation2 + $0x60] sm:$0xff]  ;;  %v493_v37 = vld [vmem:[#allocation7 + $0x18] sm:$0xff]  ;;  %v495_v40 = vld [vmem:[#allocation7 + $0x28] sm:$0xff] }
  0x5e   :  { %258 = vmatmul.mubr.f32.gmra.mrb[2].mxu0 %v69_v54  ;;  %v490_v33 = vld [vmem:[#allocation7] sm:$0xff]  ;;  %v912_v38 = vpack.c.bf16 %v493_v37, %v492_v35  ;;  %v496_v42 = vld [vmem:[#allocation7 + $0x30] sm:$0xff]  ;;  %v497_v43 = vld [vmem:[#allocation7 + $0x38] sm:$0xff] }
  0x5f   :  { %879 = vmatpush3.bf16.msra.mxu0 %v878_v53  ;;  %402 = vmatprep.mubr.f32.mxu0 %v67_v62  ;;  %v908_v36 = vpack.c.bf16 %v491_v34, %v490_v33  ;;  %v494_v39 = vld [vmem:[#allocation7 + $0x20] sm:$0xff]  ;;  %v920_v44 = vpack.c.bf16 %v497_v43, %v496_v42  ;;  %v499_v46 = vld [vmem:[#allocation7 + $0x48] sm:$0xff]  ;;  %v500_v48 = vld [vmem:[#allocation7 + $0x50] sm:$0xff] }
  0x60   :  { %333 = vmatmul.mubr.f32.gmra.mrb[2].mxu1 %v71_v59  ;;  %881 = vmatprep.subr.bf16.mxu0 %v880_v56  ;;  %v916_v41 = vpack.c.bf16 %v495_v40, %v494_v39  ;;  %v498_v45 = vld [vmem:[#allocation7 + $0x40] sm:$0xff]  ;;  %v501_v49 = vld [vmem:[#allocation7 + $0x58] sm:$0xff]  ;;  %v503_v52 = vld [vmem:[#allocation7 + $0x68] sm:$0xff] }
  0x61   :  { %770 = vmatprep.mubr.msk.f32.mxu1 %vm181_vm0, %v68_v63  ;;  %909 = vmatprep.subr.bf16.mxu1 %v908_v36  ;;  %v924_v47 = vpack.c.bf16 %v499_v46, %v498_v45  ;;  %v928_v50 = vpack.c.bf16 %v501_v49, %v500_v48  ;;  %v502_v51 = vld [vmem:[#allocation7 + $0x60] sm:$0xff]  ;;  %v504_v54 = vld [vmem:[#allocation7 + $0x70] sm:$0xff]  ;;  %v505_v55 = vld [vmem:[#allocation7 + $0x78] sm:$0xff] }
  0x62   :  { %v932_v53 = vpack.c.bf16 %v503_v52, %v502_v51  ;;  %v936_v56 = vpack.c.bf16 %v505_v55, %v504_v54  ;;  %v626_v58 = vld [vmem:[%s1153_s2] ss:$0 sm:$0xff] }
  0x63   :  { %883 = vmatpush3.bf16.msra.mxu0 %v882_v0  ;;  %v629_v24 = vld [vmem:[%s1155_s4] ss:$0 sm:$0xff]  ;;  %s1057_s4 = smov [#allocation8]  }
  0x64   :  { %771 = vmatmul.mubr.msk.f32.vlgmr.msra.gmra.mrb[4].mxu1 %vm181_vm0, %v75_v4  ;;  %885 = vmatprep.subr.bf16.mxu0 %v884_v1  ;;  %s613_s10 = sshll.u32 %s1057_s4, 4  ;;  %s614_s10 = int_to_ptr.vmem [resolvable:$true] %s613_s10 }
  0x65   :  { %911 = vmatpush3.bf16.msra.mxu1 %v908_v36  ;;  %s1022_s11 = scalar_lea.vmem %s614_s10, 256  ;;  %p1027_p11 = scmp.lt.s32.totalorder %s614_s10, %s614_s10 }
  0x66   :  { %913 = vmatprep.subr.bf16.mxu1 %v912_v38  ;;  %p1023_p10 = scmp.ne.s32.totalorder %s614_s10, %s1022_s11  ;;  %p1028_p12 = scmp.lt.s32.totalorder %s1022_s11, %s1022_s11 }
  0x67   :  { %887 = vmatpush3.bf16.msra.mxu0 %v886_v7 }
  0x68   :  { %889 = vmatprep.subr.bf16.mxu0 %v888_v8  ;;  %p1029_p13 = por %p1028_p12, %p1027_p11 }
  0x69   :  { %915 = vmatpush3.bf16.msra.mxu1 %v912_v38 }
  0x6a   :  { %917 = vmatprep.subr.bf16.mxu1 %v916_v41  ;;  %p1030_p0 = pnand %p1029_p13, %p1023_p10 }
  0x6b   :  { %891 = vmatpush3.bf16.msra.mxu0 %v890_v13 }
  0x6c   :  { %893 = vmatprep.subr.bf16.mxu0 %v892_v14 }
  0x6d   :  { %919 = vmatpush3.bf16.msra.mxu1 %v916_v41 }
  0x6e   :  { %921 = vmatprep.subr.bf16.mxu1 %v920_v44 }
  0x6f   :  { %895 = vmatpush3.bf16.msra.mxu0 %v894_v19 }
  0x70   :  { %897 = vmatprep.subr.bf16.mxu0 %v896_v20 }
  0x71   :  { %923 = vmatpush3.bf16.msra.mxu1 %v920_v44 }
  0x72   :  { %925 = vmatprep.subr.bf16.mxu1 %v924_v47 }
  0x73   :  { %899 = vmatpush3.bf16.msra.mxu0 %v898_v25 }
  0x74   :  { %901 = vmatprep.subr.bf16.mxu0 %v900_v26 }
  0x75   :  { %927 = vmatpush3.bf16.msra.mxu1 %v924_v47 }
  0x76   :  { %929 = vmatprep.subr.bf16.mxu1 %v928_v50 }
  0x77   :  { %903 = vmatpush3.bf16.msra.mxu0 %v902_v29 }
  0x79   :  { %931 = vmatpush3.bf16.msra.mxu1 %v928_v50 }
  0x7a   :  { %403 = vmatmul.mubr.f32.vlgmr.msra.gmra.mrb[4].mxu0 %v66_v30  ;;  %933 = vmatprep.subr.bf16.mxu1 %v932_v53 }
  0x7b   :  { %407 = vmatprep.mubr.f32.mxu0 %v74_v31 }
  0x7d   :  { %935 = vmatpush3.bf16.msra.mxu1 %v932_v53 }
  0x7e   :  { %408 = vmatmul.mubr.f32.gmra.mrb[6].mxu0 %v73_v32  ;;  %937 = vmatprep.subr.bf16.mxu1 %v936_v56 }
  0x81   :  { %939 = vmatpush3.bf16.msra.mxu1 %v936_v56 }
 0x12d   :  { %v662_v57 = vpop.f32.mrb[0].mxu0 }
 0x12e   :  { %v663_v59 = vpop.f32.mrb[1].mxu0 }
 0x12f   :  { %v700_v60 = vpop.f32.mrb[0].mxu1  ;;  %v664_v61 = vadd.f32 %v663_v59, %v662_v57 }
 0x130   :  { %v701_v62 = vpop.f32.mrb[1].mxu1 }
 0x131   :  { %v702_v63 = vadd.f32 %v701_v62, %v700_v60  ;;  %v255_v0 = vadd.f32 %v664_v61, %v626_v58  ;;  %v665_v1 = vpop.f32.mrb[2].mxu0 }
 0x132   :  { %v666_v2 = vpop.f32.mrb[3].mxu0 }
 0x133   :  { %v703_v3 = vpop.f32.mrb[2].mxu1  ;;  %v330_v4 = vadd.f32 %v702_v63, %v255_v0  ;;  %v667_v5 = vadd.f32 %v666_v2, %v665_v1 }
 0x134   :  { %v704_v6 = vpop.f32.mrb[3].mxu1 }
 0x135   :  { %v705_v7 = vadd.f32 %v704_v6, %v703_v3  ;;  %v260_v8 = vadd.f32 %v667_v5, %v626_v58 }
 0x137   :  { %v772_v9 = vpop.f32.mrb[4].mxu1  ;;  %v335_v10 = vadd.f32 %v705_v7, %v260_v8 }
 0x138   :  { %v479_v11 = vpop.f32.mrb[5].mxu1 }
 0x14d   :  { %v738_v12 = vpop.f32.mrb[4].mxu0 }
 0x14e   :  { %v739_v13 = vpop.f32.mrb[5].mxu0 }
 0x14f   :  { %v740_v14 = vadd.f32 %v739_v13, %v738_v12 }
 0x151   :  { %v741_v15 = vpop.f32.mrb[6].mxu0  ;;  %v405_v16 = vadd.f32 %v740_v14, %v330_v4 }
 0x152   :  { %v742_v17 = vpop.f32.mrb[7].mxu0 }
 0x153   :  { %v743_v18 = vadd.f32 %v742_v17, %v741_v15  ;;  %v480_v19 = vadd.f32 %v479_v11, %v405_v16 }
 0x155   :  { %v410_v20 = vadd.f32 %v743_v18, %v335_v10  ;;  %v488_v21 = vmax.f32 %v480_v19, 0.0 }
 0x157   :  { %v485_v22 = vadd.f32 %v772_v9, %v410_v20  ;;  %805 = vmatprep.mubr.f32.mxu1 %v488_v21 }
 0x159   :  { %v489_v23 = vmax.f32 %v485_v22, 0.0 }
 0x15b   :  { %806 = vmatmul.mubr.f32.vlgmr.msra.gmra.mrb[6].mxu1 %v489_v23 }
 0x22e   :  { %v807_v25 = vpop.f32.mrb[6].mxu1 }
 0x22f   :  { %v579_v26 = vpop.f32.mrb[7].mxu1  ;;  %v585_v28 = vadd.f32 %v807_v25, %v629_v24 }
 0x230   :  { %v580_v27 = vadd.f32 %v629_v24, %v579_v26 }
 0x232   :  { %588 = vmax.xlane.f32.xlu0 %v580_v27 }
 0x236   :  { %590 = vmax.xlane.f32.xlu0 %v585_v28 }
 0x2bf   :  { %v589_v29 = vpop.xlane.xlu0 %588 }
 0x2c0   :  { %v592_v30 = vsub.f32 %v580_v27, %v589_v29 }
 0x2c2   :  { %v594_v31 = vmul.f32 1.442695, %v592_v30 }
 0x2c3   :  { %v591_v32 = vpop.xlane.xlu0 %590 }
 0x2c4   :  { %948 = vpow2.f32 %v594_v31  ;;  %v593_v33 = vsub.f32 %v585_v28, %v591_v32 }
 0x2c6   :  { %v596_v34 = vmul.f32 1.442695, %v593_v33 }
 0x2c8   :  { %950 = vpow2.f32 %v596_v34 }
 0x2ce   :  { %v949_v35 = vpop.eup %948 }
 0x2cf   :  { %598 = vadd.xlane.f32.xlu1 %v949_v35 }
 0x2d2   :  { %v951_v36 = vpop.eup %950 }
 0x2d3   :  { %600 = vadd.xlane.f32.xlu1 %v951_v36 }
 0x35c   :  { %v599_v37 = vpop.xlane.xlu1 %598 }
 0x35d   :  { %952 = vrcp.f32 %v599_v37 }
 0x360   :  { %v601_v38 = vpop.xlane.xlu1 %600 }
 0x361   :  { %954 = vrcp.f32 %v601_v38 }
 0x367   :  { %v953_v39 = vpop.eup %952 }
 0x368   :  { %v604_v40 = vmul.f32 %v953_v39, %v949_v35 }
 0x36a   :  { %606 = vst [vmem:[#allocation8] sm:$0xff] %v604_v40 }
 0x36b   :  { %v955_v41 = vpop.eup %954 }
 0x36c   :  { %v605_v42 = vmul.f32 %v955_v41, %v951_v36 }
 0x36e   :  { %607 = vst [vmem:[#allocation8 + $0x8] sm:$0xff] %v605_v42 }
 0x36f   :  { %1033 = shalt.err (!%p1030_p0)
}
 0x370   :  { %s1034_s14 = scalar_lea.hbm %s1156_s5, 256 }
 0x371   :  { %p1035_p1 = scmp.ne.s32.totalorder %s1156_s5, %s1034_s14  ;;  %p1038_p2 = scmp.lt.u32.totalorder %s1034_s14, %s1156_s5 }
 0x373   :  { %p1040_p3 = pnand %p1038_p2, %p1035_p1 }
 0x375   :  { %1043 = shalt.err (!%p1040_p3)
}
 0x376   :  { %619 = dma.vmem_to_hbm [thread:$0]  %s614_s10, 256, %s1156_s5, [#allocation4], %s1051_s28, %s1051_s28, %s1052_s29  }
 0x377   :  { %1048 = dma.done.wait [#allocation4], 256  }
 0x378   :  { %1049 = vsyncadd [#allocation4], 4294967040 }
 0x379   :  { %623 = vsyncpa [#allocation3], 1 }
 0x37a   :  { %624 = vsyncpa [#allocation6], 1 }
 0x37b   :  { %625 = vsyncpa [#allocation4], 1 }

</bundles_post_ra>
